<compile_context>
chip_gen: v7x
topology: tpu7x:2x2x1
jax: 0.10.0
libtpu: 0.0.40
codegen_flags: <defaults>
</compile_context>

<pallas_src>
from typing import NamedTuple

import jax
import jax.numpy as jnp
from jax import lax
from jax.experimental import pallas as pl
from jax.experimental.pallas import tpu as pltpu


_K_CHUNK = 1024          # 1024 * 127^2 < 2^24  ->  every bf16 chunk partial is exact in f32
_MIB = 1 << 20


def _round_up(x, m):
    return ((x + m - 1) // m) * m


def _device_kind():
    try:
        return jax.devices()[0].device_kind.lower()
    except Exception:
        return ""


def _tpu_generation():
    kind = _device_kind()
    for g in ("v7", "v6", "v5", "v4"):
        if g in kind:
            return g
    return None


def _has_int8_mxu(gen):
    # integer MXU exists on v5/v6; v7x dropped it; v4/unknown -> bf16 fallback.
    return gen in ("v5", "v6")


def _default_tm(gen):
    # v6e int8 path is weight-bandwidth bound at tm=256 for prefill -> raise to 512.
    return 512 if gen == "v6" else 256


def _vmem_cap_bytes(gen):
    if gen in ("v5", "v6"):
        return 100 * _MIB          # 128 MiB physical VMEM
    if gen == "v7":
        return 48 * _MIB           # 64 MiB physical VMEM
    return None


# ----------------------------------------------------------------------------
# Weight preparation (do ONCE at model init).
# ----------------------------------------------------------------------------
class W8A8PreparedWeight(NamedTuple):
    """int8 weight pre-transposed to (K, Np) and N-padded; build once at init."""
    w_kn: jax.Array       # (K, Np) int8
    out_features: int     # true N
    block_n: int          # N tile width the padding was done for


def prepare_w8a8_weight(weight_int8, tn=256):
    N, K = weight_int8.shape
    block_n = N if N <= tn else tn
    Np = _round_up(N, block_n)
    w_kn = weight_int8.T                       # (K, N)
    if Np != N:
        w_kn = jnp.pad(w_kn, ((0, 0), (0, Np - N)))
    return W8A8PreparedWeight(w_kn=w_kn, out_features=N, block_n=block_n)


# ----------------------------------------------------------------------------
# Kernel building blocks.
# ----------------------------------------------------------------------------
def _quantize(x_f32, per_token, dq, qs):
    """Return (rounded & clipped activations in f32, dequant scale (TM,1)/scalar)."""
    if per_token:
        absmax = jnp.max(jnp.abs(x_f32), axis=-1, keepdims=True)      # (TM, 1)
        # guard all-zero rows (incl. M-padding rows) against 0/0 -> NaN
        qsr = jnp.maximum(absmax * (1.0 / 127.0), jnp.finfo(jnp.float32).tiny)
        scale = dq * qsr
    else:
        # NOTE: like the PyTorch module, a zero quant_scale is not guarded.
        qsr = qs
        scale = dq
    # reciprocal of a (TM,1)/scalar + multiply instead of a (TM,K) divide.
    inv = 1.0 / qsr
    xq = jnp.clip(jnp.round(x_f32 * inv), -128.0, 127.0)
    return xq, scale


def _int8_matmul(xq, w_ref, use_int8_mxu):
    """Exact int8 x int8 -> int32 GEMM of a (TM,K) tile against a (K,TN) int8 tile.

    v5e/v6e: native integer MXU (int32 accumulation).
    v7x/others: split-K over <=1024-wide chunks on the bf16 MXU; each chunk's
    f32 partial is exact (1024*127^2 < 2^24) and partials accumulate in int32,
    keeping the result bit-exact vs int32 accumulation for any realistic K.
    Chunking also keeps the per-step bf16 weight-cast temporary small.
    """
    if use_int8_mxu:
        return lax.dot_general(xq[...], w_ref[...], (((1,), (0,)), ((), ())),
                               preferred_element_type=jnp.int32)
    tm = xq.shape[0]
    K, tn = w_ref.shape
    acc = jnp.zeros((tm, tn), jnp.int32)
    for k0 in range(0, K, _K_CHUNK):
        kc = min(_K_CHUNK, K - k0)
        part = lax.dot_general(
            xq[:, k0:k0 + kc].astype(jnp.bfloat16),
            w_ref[k0:k0 + kc, :].astype(jnp.bfloat16),
            (((1,), (0,)), ((), ())),
            preferred_element_type=jnp.float32)
        acc = acc + part.astype(jnp.int32)
    return acc


def _make_cached_kernel(per_token, use_bias, use_int8_mxu):
    """Prefill path (multi M tiles): quantize once per M tile, reuse across N."""
    def kernel(*refs):
        if use_bias:
            x_ref, w_ref, sc_ref, b_ref, o_ref, xq_ref, scale_ref = refs
        else:
            x_ref, w_ref, sc_ref, o_ref, xq_ref, scale_ref = refs
            b_ref = None
        j = pl.program_id(1)

        @pl.when(j == 0)
        def _quant():
            x = x_ref[...].astype(jnp.float32)
            xq, scale = _quantize(x, per_token, sc_ref[0, 0], sc_ref[0, 1])
            xq_ref[...] = xq.astype(xq_ref.dtype)
            if per_token:
                scale_ref[...] = scale
            else:
                scale_ref[...] = jnp.full(scale_ref.shape, scale, jnp.float32)

        acc = _int8_matmul(xq_ref, w_ref, use_int8_mxu)
        out = scale_ref[...] * acc.astype(jnp.float32)
        if use_bias:
            out = out + b_ref[...]
        o_ref[...] = out.astype(o_ref.dtype)

    return kernel


def _make_direct_kernel(per_token, use_bias, use_int8_mxu):
    """Decode path (single M tile): quantize in-register each step; no scratch
    carried across grid steps, so both grid axes can be 'parallel' (v7x 2 TCs)."""
    xq_dtype = jnp.int8 if use_int8_mxu else jnp.bfloat16

    def kernel(*refs):
        if use_bias:
            x_ref, w_ref, sc_ref, b_ref, o_ref = refs
        else:
            x_ref, w_ref, sc_ref, o_ref = refs
            b_ref = None
        x = x_ref[...].astype(jnp.float32)
        xq, scale = _quantize(x, per_token, sc_ref[0, 0], sc_ref[0, 1])
        acc = _int8_matmul(xq.astype(xq_dtype), w_ref, use_int8_mxu)
        out = scale * acc.astype(jnp.float32)
        if use_bias:
            out = out + b_ref[...]
        o_ref[...] = out.astype(o_ref.dtype)

    return kernel


def _vmem_estimate(tm, tn, K, x_bytes, xq_bytes, out_bytes, use_bias,
                   cache_xq, use_int8_mxu):
    b = 2 * tm * K * x_bytes          # x tile (double-buffered)
    b += 2 * K * tn                   # int8 weight tile (double-buffered)
    b += 2 * tm * tn * out_bytes      # output tile (double-buffered)
    if use_bias:
        b += 2 * tn * 4
    if cache_xq:
        b += tm * K * xq_bytes + tm * 4   # cached xq + per-row scale
    if not use_int8_mxu:
        b += min(K, _K_CHUNK) * tn * 2    # per-chunk bf16 weight cast temp
        b += tm * tn * 4                  # int32 split-K accumulator
    b += tm * tn * 4                      # f32 epilogue temp / headroom
    return b


# ----------------------------------------------------------------------------
# Forward wrapper.
# ----------------------------------------------------------------------------
def w8a8_linear_with_quant_scale(x, weight, dequant_scale, bias=None,
                                 quant_scale=1.0, act_quant="per-token",
                                 tm=None, tn=256, use_int8_mxu=None):
    assert act_quant in ("per-token", "per-tensor")

    if isinstance(weight, W8A8PreparedWeight):
        prepared = weight
    else:
        # TODO(synk): call prepare_w8a8_weight() once at model init; preparing
        # here costs an extra full HBM pass over the weight on every call.
        prepared = prepare_w8a8_weight(weight, tn=tn)

    gen = _tpu_generation()
    if use_int8_mxu is None:
        use_int8_mxu = _has_int8_mxu(gen)
    if tm is None:
        tm = _default_tm(gen)

    x_shape = x.shape
    dtype = x.dtype
    K = x_shape[-1]
    N = prepared.out_features
    Np = prepared.w_kn.shape[1]
    assert prepared.w_kn.shape[0] == K
    tn_eff = prepared.block_n

    x2 = x.reshape(-1, K)                 # native dtype; upcast happens in-kernel
    M = x2.shape[0]

    xq_dtype = jnp.int8 if use_int8_mxu else jnp.bfloat16
    pack = 32 if use_int8_mxu else 16     # sublane pack of the quantized dtype
    x_bytes = jnp.dtype(x2.dtype).itemsize
    out_bytes = jnp.dtype(dtype).itemsize
    xq_bytes = 1 if use_int8_mxu else 2

    tm_eff = _round_up(M, pack) if M <= tm else tm

    # Keep the tile budget inside the per-generation scoped-VMEM cap
    # (v7x only has 64 MiB total VMEM).
    cap = _vmem_cap_bytes(gen)
    if cap is not None:
        while (tm_eff > pack and
               _vmem_estimate(tm_eff, tn_eff, K, x_bytes, xq_bytes, out_bytes,
                              bias is not None, True, use_int8_mxu) > cap):
            tm_eff = max(pack, _round_up(tm_eff // 2, pack))

    Mp = _round_up(M, tm_eff)
    if Mp != M:
        # TODO(synk): a masked edge tile would avoid this activation pad copy.
        x2 = jnp.pad(x2, ((0, Mp - M), (0, 0)))

    grid = (Mp // tm_eff, Np // tn_eff)
    cache_xq = grid[0] > 1
    use_bias = bias is not None

    scales = jnp.asarray([[dequant_scale, quant_scale]], jnp.float32)   # (1, 2)

    args = [x2, prepared.w_kn, scales]
    in_specs = [
        pl.BlockSpec((tm_eff, K), lambda i, j: (i, 0)),       # activations
        pl.BlockSpec((K, tn_eff), lambda i, j: (0, j)),       # int8 weight (K, tn)
        pl.BlockSpec((1, 2), lambda i, j: (0, 0),
                     memory_space=pltpu.SMEM),                # [dequant, quant] scales
    ]
    if use_bias:
        bias_arr = jnp.asarray(bias, jnp.float32)
        if Np != N:
            bias_arr = jnp.pad(bias_arr, (0, Np - N))
        args.append(bias_arr.reshape(1, Np))
        in_specs.append(pl.BlockSpec((1, tn_eff), lambda i, j: (0, j)))

    per_token = act_quant == "per-token"
    if cache_xq:
        kernel = _make_cached_kernel(per_token, use_bias, use_int8_mxu)
        scratch_shapes = [pltpu.VMEM((tm_eff, K), xq_dtype),      # cached quantized x
                          pltpu.VMEM((tm_eff, 1), jnp.float32)]   # per-row dequant scale
        # scratch written at j == 0 is reused across N tiles -> N axis "arbitrary".
        dim_sem = ("parallel", "arbitrary")
    else:
        kernel = _make_direct_kernel(per_token, use_bias, use_int8_mxu)
        scratch_shapes = []
        dim_sem = ("parallel", "parallel")

    est = _vmem_estimate(tm_eff, tn_eff, K, x_bytes, xq_bytes, out_bytes,
                         use_bias, cache_xq, use_int8_mxu)
    vmem_limit = None if cap is None else int(min(cap, max(est + 8 * _MIB, 32 * _MIB)))

    out = pl.pallas_call(
        kernel,
        out_shape=jax.ShapeDtypeStruct((Mp, Np), dtype),
        grid_spec=pltpu.PrefetchScalarGridSpec(
            num_scalar_prefetch=0,
            grid=grid,
            in_specs=in_specs,
            out_specs=pl.BlockSpec((tm_eff, tn_eff), lambda i, j: (i, j)),
            scratch_shapes=scratch_shapes),
        compiler_params=pltpu.CompilerParams(
            dimension_semantics=dim_sem,
            vmem_limit_bytes=vmem_limit),
    )(*args)

    out = out[:M, :N]
    return out.reshape(*x_shape[:-1], N)


# ----------------------------------------------------------------------------
# Pure-JAX reference (exact int32 accumulation) + self-test.
# ----------------------------------------------------------------------------
def _reference(x, w_i8, dq, bias, qscale, act_quant):
    x_shape = x.shape
    x2 = x.reshape(-1, x_shape[-1]).astype(jnp.float32)
    dq = jnp.float32(dq)
    if act_quant == "per-token":
        qs = jnp.maximum(jnp.max(jnp.abs(x2), axis=-1, keepdims=True) / 127.0,
                         jnp.finfo(jnp.float32).tiny)
        dequant = dq * qs
    else:
        qs = jnp.float32(qscale)
        dequant = dq
    xq = jnp.clip(jnp.round(x2 * (1.0 / qs)), -128, 127).astype(jnp.int32)
    acc = lax.dot_general(xq, w_i8.astype(jnp.int32),
                          (((1,), (1,)), ((), ()))).astype(jnp.float32)
    out = dequant * acc
    if bias is not None:
        out = out + bias[None, :]
    return out.reshape(*x_shape[:-1], -1).astype(x.dtype)


if __name__ == "__main__":
    key = jax.random.PRNGKey(0)
    k_x, k_w, k_b = jax.random.split(key, 3)

    batch, seq, in_features, out_features = 2, 8, 32, 64

    # deterministic "module buffers"
    weight_i8 = jax.random.randint(k_w, (out_features, in_features), -127, 128,
                                   dtype=jnp.int32).astype(jnp.int8)
    bias = (0.1 * jax.random.normal(k_b, (out_features,))).astype(jnp.float32)
    dequant_scale = 0.0123   # scalar buffer
    quant_scale = 0.05       # scalar buffer (per-tensor mode only)

    x = (3.0 * jax.random.normal(k_x, (batch, seq, in_features))).astype(jnp.float32)

    # weight prep (transpose + N-pad) hoisted out of the forward: done once here.
    w_prepared = prepare_w8a8_weight(weight_i8)

    cases = [
        dict(act_quant="per-token", bias=bias, tm=None),    # decode/direct path
        dict(act_quant="per-tensor", bias=bias, tm=None),   # per-tensor mode
        dict(act_quant="per-token", bias=None, tm=None),    # no-bias variant
        dict(act_quant="per-token", bias=bias, tm=8),       # multi-M-tile cached path
    ]
    ok = True
    for case in cases:
        out = w8a8_linear_with_quant_scale(
            x, w_prepared, dequant_scale, bias=case["bias"],
            quant_scale=quant_scale, act_quant=case["act_quant"], tm=case["tm"])
        out = jax.block_until_ready(out)
        ref = _reference(x, weight_i8, dequant_scale, case["bias"],
                         quant_scale, case["act_quant"])
        if out.shape != (batch, seq, out_features) or out.dtype != x.dtype:
            ok = False
        if not jnp.allclose(out, ref, rtol=1e-5, atol=1e-5):
            ok = False

    print("KERNEL_OK" if ok else "KERNEL_MISMATCH")
</pallas_src>

<mosaic_0001>
module attributes {stable_mosaic.version = 11 : i64} {
  func.func @kernel(%arg0: i32, %arg1: i32, %arg2: memref<16x32xf32, #tpu.memory_space<vmem>>, %arg3: memref<32x64xi8, #tpu.memory_space<vmem>>, %arg4: memref<1x2xf32, #tpu.memory_space<smem>>, %arg5: memref<1x64xf32, #tpu.memory_space<vmem>>, %arg6: memref<16x64xf32, #tpu.memory_space<vmem>>) attributes {dimension_semantics = [#tpu.dimension_semantics<parallel>, #tpu.dimension_semantics<parallel>], iteration_bounds = array<i64: 1, 1>, scalar_prefetch = 0 : i64, scratch_operands = 0 : i64, tpu.core_type = #tpu.core_type<tc>, window_params = [{transform_indices = @transform_0, window_bounds = array<i64: 16, 32>}, {transform_indices = @transform_1, window_bounds = array<i64: 32, 64>}, {transform_indices = @transform_2, window_bounds = array<i64: 1, 2>}, {transform_indices = @transform_3, window_bounds = array<i64: 1, 64>}, {transform_indices = @transform_4, window_bounds = array<i64: 16, 64>}]} {
    %c0 = arith.constant 0 : index
    %c0_0 = arith.constant 0 : index
    %0 = vector.load %arg2[%c0, %c0_0] : memref<16x32xf32, #tpu.memory_space<vmem>>, vector<16x32xf32>
    %c0_1 = arith.constant 0 : index
    %c0_2 = arith.constant 0 : index
    %1 = memref.load %arg4[%c0_1, %c0_2] : memref<1x2xf32, #tpu.memory_space<smem>>
    %2 = math.absf %0 : vector<16x32xf32>
    %cst = arith.constant dense<0xFF800000> : vector<16xf32>
    %3 = vector.multi_reduction <maximumf>, %2, %cst [1] : vector<16x32xf32> to vector<16xf32>
    %4 = vector.shape_cast %3 : vector<16xf32> to vector<16x1xf32>
    %cst_3 = arith.constant 0.00787401571 : f32
    %5 = vector.broadcast %cst_3 : f32 to vector<16x1xf32>
    %6 = arith.mulf %4, %5 : vector<16x1xf32>
    %cst_4 = arith.constant 1.17549435E-38 : f32
    %7 = vector.broadcast %cst_4 : f32 to vector<16x1xf32>
    %8 = arith.maximumf %6, %7 : vector<16x1xf32>
    %9 = vector.broadcast %1 : f32 to vector<16x1xf32>
    %10 = arith.mulf %9, %8 : vector<16x1xf32>
    %cst_5 = arith.constant 1.000000e+00 : f32
    %11 = vector.broadcast %cst_5 : f32 to vector<16x1xf32>
    %12 = arith.divf %11, %8 : vector<16x1xf32>
    %13 = vector.broadcast %12 : vector<16x1xf32> to vector<16x32xf32>
    %14 = arith.mulf %0, %13 : vector<16x32xf32>
    %15 = math.roundeven %14 : vector<16x32xf32>
    %cst_6 = arith.constant -1.280000e+02 : f32
    %cst_7 = arith.constant 1.270000e+02 : f32
    %16 = vector.broadcast %cst_6 : f32 to vector<16x32xf32>
    %17 = arith.maximumf %16, %15 : vector<16x32xf32>
    %18 = vector.broadcast %cst_7 : f32 to vector<16x32xf32>
    %19 = arith.minimumf %18, %17 : vector<16x32xf32>
    %20 = arith.truncf %19 : vector<16x32xf32> to vector<16x32xbf16>
    %c0_i32 = arith.constant 0 : i32
    %21 = vector.broadcast %c0_i32 : i32 to vector<16x64xi32>
    %c0_8 = arith.constant 0 : index
    %c0_9 = arith.constant 0 : index
    %22 = vector.load %arg3[%c0_8, %c0_9] : memref<32x64xi8, #tpu.memory_space<vmem>>, vector<32x64xi8>
    %23 = arith.sitofp %22 : vector<32x64xi8> to vector<32x64xbf16>
    %cst_10 = arith.constant dense<0.000000e+00> : vector<16x64xf32>
    %24 = tpu.matmul %20, %23, %cst_10 {dimension_numbers = #tpu.dot_dimension_numbers<[1], [0], [0], [1], [0, 0, 1, 1], [], []>} : vector<16x32xbf16>, vector<32x64xbf16>, vector<16x64xf32> -> vector<16x64xf32>
    %25 = arith.fptosi %24 : vector<16x64xf32> to vector<16x64xi32>
    %26 = arith.addi %21, %25 : vector<16x64xi32>
    %27 = arith.sitofp %26 : vector<16x64xi32> to vector<16x64xf32>
    %28 = vector.broadcast %10 : vector<16x1xf32> to vector<16x64xf32>
    %29 = arith.mulf %28, %27 : vector<16x64xf32>
    %c0_11 = arith.constant 0 : index
    %c0_12 = arith.constant 0 : index
    %30 = vector.load %arg5[%c0_11, %c0_12] : memref<1x64xf32, #tpu.memory_space<vmem>>, vector<1x64xf32>
    %31 = vector.broadcast %30 : vector<1x64xf32> to vector<16x64xf32>
    %32 = arith.addf %29, %31 : vector<16x64xf32>
    %c0_13 = arith.constant 0 : index
    %c0_14 = arith.constant 0 : index
    %33 = vector.load %arg6[%c0_13, %c0_14] : memref<16x64xf32, #tpu.memory_space<vmem>>, vector<16x64xf32>
    tpu.vector_store %arg6[%c0_13, %c0_14], %32 {strides = array<i32>} : memref<16x64xf32, #tpu.memory_space<vmem>>, vector<16x64xf32>,
    return
  }
  func.func @transform_0(%arg0: i32, %arg1: i32) -> (i32, i32) {
    %c0_i32 = arith.constant 0 : i32
    %c0_i32_0 = arith.constant 0 : i32
    return %arg0, %c0_i32 : i32, i32
  }
  func.func @transform_1(%arg0: i32, %arg1: i32) -> (i32, i32) {
    %c0_i32 = arith.constant 0 : i32
    %c0_i32_0 = arith.constant 0 : i32
    return %c0_i32, %arg1 : i32, i32
  }
  func.func @transform_2(%arg0: i32, %arg1: i32) -> (i32, i32) {
    %c0_i32 = arith.constant 0 : i32
    %c0_i32_0 = arith.constant 0 : i32
    %c0_i32_1 = arith.constant 0 : i32
    return %c0_i32, %c0_i32_0 : i32, i32
  }
  func.func @transform_3(%arg0: i32, %arg1: i32) -> (i32, i32) {
    %c0_i32 = arith.constant 0 : i32
    %c0_i32_0 = arith.constant 0 : i32
    return %c0_i32, %arg1 : i32, i32
  }
  func.func @transform_4(%arg0: i32, %arg1: i32) -> (i32, i32) {
    %c0_i32 = arith.constant 0 : i32
    return %arg0, %arg1 : i32, i32
  }
}

</mosaic_0001>

<bundles_post_ra>
// kernel: tpu_custom_call.1
= control target key start
LH: loop header
LB: loop body
LE: loop exit
PB: predicated region body
PF: predicated region fallthrough
CT: control target
= control target key end

     0   :  { %9 = vsyncpa [#allocation3], 0  ;;  %s375_s0 = inlined_call_operand.hbm [shape: f32[16,32], index: 0, kind: input, shape index: {}]   ;;  %s376_s1 = inlined_call_operand.hbm [shape: s8[32,64], index: 1, kind: input, shape index: {}]   ;;  %s377_s2 = inlined_call_operand.vmem [shape: f32[1,2], index: 2, kind: input, shape index: {}]   ;;  %s378_s3 = inlined_call_operand.vmem [shape: f32[1,64], index: 3, kind: input, shape index: {}]   ;;  %s379_s4 = inlined_call_operand.hbm [shape: f32[16,64], index: 4, kind: output, shape index: {}]  }
   0x1   :  { %10 = vsyncpa [#allocation7], 0 }
   0x2   :  { %11 = vsyncpa [#allocation5], 0 }
   0x3   :  { %12 = vsyncpa [#allocation4], 0  ;;  %s291_s15 = smov [#allocation2]   ;;  %s205_s19 = scalar_lea.hbm %s375_s0, 256 }
   0x4   :  { %s18_s16 = sshll.u32 %s291_s15, 4  ;;  %p206_p0 = scmp.ne.s32.totalorder %s375_s0, %s205_s19  ;;  %s19_s16 = int_to_ptr.vmem [resolvable:$true] %s18_s16 }
   0x5   :  { %p209_p1 = scmp.lt.u32.totalorder %s205_s19, %s375_s0 }
   0x7   :  { %p211_p2 = pnand %p209_p1, %p206_p0 }
   0x9   :  { %214 = shalt.err (!%p211_p2)
}
   0xa   :  { %s215_s24 = scalar_lea.vmem %s19_s16, 256  ;;  %p220_p4 = scmp.lt.s32.totalorder %s19_s16, %s19_s16 }
   0xb   :  { %p216_p3 = scmp.ne.s32.totalorder %s19_s16, %s215_s24  ;;  %p221_p5 = scmp.lt.s32.totalorder %s215_s24, %s215_s24 }
   0xd   :  { %p222_p6 = por %p221_p5, %p220_p4 }
   0xf   :  { %p223_p7 = pnand %p222_p6, %p216_p3 }
  0x11   :  { %226 = shalt.err (!%p223_p7)
}
  0x12   :  { %s292_s25 = smov 128   ;;  %s293_s26 = smov 8  }
  0x13   :  { %24 = dma.hbm_to_vmem [thread:$0]  %s375_s0, 256, %s19_s16, [#allocation3], %s292_s25, %s292_s25, %s293_s26  }
  0x14   :  { %s294_s29 = smov [#allocation6]   ;;  %s41_s7 = sshll.u32 %s377_s2, 4  ;;  %s42_s7 = int_to_ptr.vmem [resolvable:$true] %s41_s7 }
  0x15   :  { %s31_s30 = sshll.u32 %s294_s29, 4  ;;  %s227_s10 = scalar_lea.hbm %s376_s1, 128  ;;  %s32_s30 = int_to_ptr.vmem [resolvable:$true] %s31_s30 }
  0x16   :  { %p228_p8 = scmp.ne.s32.totalorder %s376_s1, %s227_s10  ;;  %p231_p9 = scmp.lt.u32.totalorder %s227_s10, %s376_s1 }
  0x18   :  { %p233_p10 = pnand %p231_p9, %p228_p8 }
  0x1a   :  { %236 = shalt.err (!%p233_p10)
}
  0x1b   :  { %s237_s0 = scalar_lea.vmem %s32_s30, 128  ;;  %p242_p12 = scmp.lt.s32.totalorder %s32_s30, %s32_s30 }
  0x1c   :  { %p238_p11 = scmp.ne.s32.totalorder %s32_s30, %s237_s0  ;;  %p243_p13 = scmp.lt.s32.totalorder %s237_s0, %s237_s0 }
  0x1e   :  { %p244_p0 = por %p243_p13, %p242_p12 }
  0x20   :  { %p245_p1 = pnand %p244_p0, %p238_p11 }
  0x22   :  { %248 = shalt.err (!%p245_p1)
}
  0x23   :  { %34 = dma.hbm_to_vmem [thread:$0]  %s376_s1, 128, %s32_s30, [#allocation7]  }
  0x24   :  { %s249_s16 = scalar_lea.vmem %s42_s7, 16  ;;  %p254_p3 = scmp.lt.s32.totalorder %s42_s7, %s42_s7 }
  0x25   :  { %p250_p2 = scmp.ne.s32.totalorder %s42_s7, %s249_s16  ;;  %p255_p4 = scmp.lt.s32.totalorder %s249_s16, %s249_s16 }
  0x27   :  { %p256_p5 = por %p255_p4, %p254_p3 }
  0x29   :  { %p257_p6 = pnand %p256_p5, %p250_p2 }
  0x2b   :  { %260 = shalt.err (!%p257_p6)
}
  0x2c   :  { %s295_s17 = smov [#allocation8]  }
  0x2d   :  { %44 = dma.vmem_to_smem %s42_s7, 16, %s295_s17, [#allocation5]  }
  0x2e   :  { %283 = dma.done.wait [#allocation3], 256  }
  0x2f   :  { %284 = vsyncadd [#allocation3], 4294967040 }
  0x30   :  { %285 = dma.done.wait [#allocation7], 128  }
  0x31   :  { %286 = vsyncadd [#allocation7], 4294967168 }
  0x32   :  { %287 = dma.done.wait [#allocation5], 16  }
  0x33   :  { %288 = vsyncadd [#allocation5], 4294967280 }
  0x34   :  { %56 = sfence }
  0x35   :  { %v58_v0 = vld [vmem:[#allocation2] sm:$0xff]  ;;  %vm63_vm0 = vcmask 261120   ;;  %v59_v1 = vld [vmem:[#allocation2 + $0x8] sm:$0xff]  ;;  %v90_v6 = vld [vmem:[#allocation6] sm:$0xff]  ;;  %v296_v7 = vmov 0.0   ;;  %vm297_vm1 = vmmov 0  }
  0x36   :  { %v61_v2 = vand.u32 2147483647, %v58_v0  ;;  %v62_v3 = vand.u32 2147483647, %v59_v1  ;;  %179 = vmatprep.subr.bf16.mxu0 %v296_v7  ;;  %v91_v8 = vunpack.c.l.s8.bf16 %v90_v6  ;;  %183 = vmatprep.mubr.msk.bf16.mxu0 %vm297_vm1, %v296_v7  ;;  %v92_v9 = vunpack.c.h.s8.bf16 %v90_v6  ;;  %s60_s1 = sld [smem:[#allocation8]]  ;;  %s298_s20 = smov [#allocation9]  }
  0x37   :  { %v175_v38 = vld [vmem:[%s378_s3] ss:$0 sm:$0xff]  ;;  %vm152_vm2 = vcmask 523264   ;;  %s160_s21 = sshll.u32 %s298_s20, 4  ;;  %s161_s21 = int_to_ptr.vmem [resolvable:$true] %s160_s21 }
  0x38   :  { %v64_v4 = vsel %vm63_vm0, %v61_v2, -inf  ;;  %v67_v5 = vsel %vm63_vm0, %v62_v3, -inf  ;;  %180 = vmatpush3.bf16.msra.mxu0 %v91_v8  ;;  %s261_s22 = scalar_lea.vmem %s161_s21, 256  ;;  %p266_p8 = scmp.lt.s32.totalorder %s161_s21, %s161_s21 }
  0x39   :  { %65 = vmax.xlane.f32.xlu0 %v64_v4  ;;  %181 = vmatprep.subr.bf16.mxu0 %v296_v7  ;;  %p262_p7 = scmp.ne.s32.totalorder %s161_s21, %s261_s22  ;;  %p267_p9 = scmp.lt.s32.totalorder %s261_s22, %s261_s22 }
  0x3b   :  { %p268_p10 = por %p267_p9, %p266_p8 }
  0x3c   :  { %182 = vmatpush3.bf16.msra.mxu0 %v92_v9  ;;  %v74_v30 = vstv %s60_s1 }
  0x3d   :  { %68 = vmax.xlane.f32.xlu0 %v67_v5  ;;  %p269_p11 = pnand %p268_p10, %p262_p7 }
  0xc6   :  { %v66_v10 = vpop.xlane.xlu0 %65 }
  0xc7   :  { %v70_v11 = vmul.f32 0.007874016, %v66_v10 }
  0xc9   :  { %v72_v12 = vmax.f32 %v70_v11, 1.1754944e-38 }
  0xca   :  { %v69_v13 = vpop.xlane.xlu0 %68 }
  0xcb   :  { %201 = vrcp.f32 %v72_v12  ;;  %v71_v14 = vmul.f32 0.007874016, %v69_v13  ;;  %v75_v35 = vmul.f32 %v74_v30, %v72_v12 }
  0xcd   :  { %v73_v15 = vmax.f32 %v71_v14, 1.1754944e-38 }
  0xcf   :  { %203 = vrcp.f32 %v73_v15  ;;  %v76_v39 = vmul.f32 %v74_v30, %v73_v15 }
  0xd5   :  { %v202_v16 = vpop.eup %201 }
  0xd6   :  { %v81_v17 = vmul.f32 %v202_v16, %v58_v0 }
  0xd8   :  { %v187_v18 = vround.rtne.f32 %v81_v17 }
  0xd9   :  { %v204_v19 = vpop.eup %203 }
  0xda   :  { %v82_v20 = vmul.f32 %v204_v19, %v59_v1  ;;  %v85_v22 = vmax.f32 %v187_v18, -128.0 }
  0xdc   :  { %v188_v21 = vround.rtne.f32 %v82_v20  ;;  %v87_v24 = vmin.f32 %v85_v22, 127.0 }
  0xde   :  { %v86_v23 = vmax.f32 %v188_v21, -128.0 }
  0xe0   :  { %v88_v25 = vmin.f32 %v86_v23, 127.0 }
  0xe2   :  { %v89_v26 = vpack.c.bf16 %v88_v25, %v87_v24 }
  0xe4   :  { %184 = vmatmul.mubr.msk.bf16.vlgmr.msra.gmra.mrb[0].mxu0 %vm63_vm0, %v89_v26 }
 0x1b7   :  { %v130_v27 = vpop.f32.mrb[0].mxu0 }
 0x1b8   :  { %v189_v28 = vtrunc.f32 %v130_v27  ;;  %v185_v29 = vpop.f32.mrb[1].mxu0 }
 0x1b9   :  { %v133_v31 = vpop.f32.mrb[2].mxu0 }
 0x1ba   :  { %v190_v32 = vcvt.f32.s32 %v189_v28  ;;  %v191_v33 = vtrunc.f32 %v133_v31  ;;  %v186_v34 = vpop.f32.mrb[3].mxu0 }
 0x1bc   :  { %v139_v36 = vcvt.s32.f32 %v190_v32  ;;  %v192_v37 = vcvt.f32.s32 %v191_v33 }
 0x1be   :  { %v141_v40 = vmul.f32 %v139_v36, %v75_v35  ;;  %v140_v41 = vcvt.s32.f32 %v192_v37 }
 0x1c0   :  { %v142_v42 = vmul.f32 %v140_v41, %v76_v39  ;;  %v150_v43 = vadd.f32 %v175_v38, %v141_v40 }
 0x1c2   :  { %v151_v44 = vadd.f32 %v175_v38, %v142_v42  ;;  %153 = vst.msk [vmem:[#allocation9] sm:$0xff] %vm152_vm2, %v150_v43 }
 0x1c4   :  { %154 = vst.msk [vmem:[#allocation9 + $0x8] sm:$0xff] %vm152_vm2, %v151_v44 }
 0x1c5   :  { %272 = shalt.err (!%p269_p11)
}
 0x1c6   :  { %s273_s24 = scalar_lea.hbm %s379_s4, 256 }
 0x1c7   :  { %p274_p12 = scmp.ne.s32.totalorder %s379_s4, %s273_s24  ;;  %p277_p13 = scmp.lt.u32.totalorder %s273_s24, %s379_s4 }
 0x1c9   :  { %p279_p0 = pnand %p277_p13, %p274_p12 }
 0x1cb   :  { %282 = shalt.err (!%p279_p0)
}
 0x1cc   :  { %166 = dma.vmem_to_hbm [thread:$0]  %s161_s21, 256, %s379_s4, [#allocation4], %s292_s25, %s292_s25, %s293_s26  }
 0x1cd   :  { %289 = dma.done.wait [#allocation4], 256  }
 0x1ce   :  { %290 = vsyncadd [#allocation4], 4294967040 }
 0x1cf   :  { %170 = vsyncpa [#allocation3], 1 }
 0x1d0   :  { %171 = vsyncpa [#allocation7], 1 }
 0x1d1   :  { %172 = vsyncpa [#allocation4], 1 }
 0x1d2   :  { %173 = vsyncpa [#allocation5], 1 }

</bundles_post_ra>
